<compile_context>
chip_gen: v6e
topology: v6e:2x2x1
jax: 0.10.0
libtpu: 0.0.40
codegen_flags: <defaults>
</compile_context>

<pallas_src>
import functools

import jax
import jax.numpy as jnp
from jax.experimental import pallas as pl
from jax.experimental.pallas import tpu as pltpu

_LANE = 128
_SUBLANE_BF16 = 16      # bf16 packs 16 rows per sublane tile
_TILE_B = 256           # fills the 2x256 MXU rows on v6e/v7x; "parallel" splits across v7x TCs

_VMEM_FULL = pl.BlockSpec(memory_space=pltpu.MemorySpace.VMEM)


def _round_up(x, m):
    return (x + m - 1) // m * m


# ----------------------------------------------------------------------------
# Kernel (shared by decode / predict / fused paths)
# ----------------------------------------------------------------------------
def _head_kernel(num_classes, compute_dtype, write_logits, write_probs,
                 x_ref, w_ref, b_ref, *out_refs):
    # x: [tb, Dp] (caller dtype), w: [Dp, Cp] (param dtype), b: [1, Cp] f32.
    x = x_ref[...].astype(compute_dtype)
    w = w_ref[...].astype(compute_dtype)
    logits = jnp.dot(x, w, preferred_element_type=jnp.float32) + b_ref[...]  # [tb, Cp] f32

    idx = 0
    if write_logits:
        out_refs[idx][...] = logits.astype(out_refs[idx].dtype)
        idx += 1

    if write_probs:
        # Mask zero-padded class columns so softmax only sees real classes.
        col = jax.lax.broadcasted_iota(jnp.int32, logits.shape, 1)
        valid = col < num_classes
        masked = jnp.where(valid, logits, -jnp.inf)
        m = jnp.max(masked, axis=1, keepdims=True)
        e = jnp.where(valid, jnp.exp(masked - m), 0.0)
        denom = jnp.sum(e, axis=1, keepdims=True)
        probs = e * pl.reciprocal(denom, approx=True)   # EUP slot, ~free here
        out_refs[idx][...] = probs.astype(out_refs[idx].dtype)


# ----------------------------------------------------------------------------
# pallas_call dispatcher (no-grid for small batches, "parallel" batch grid else)
# ----------------------------------------------------------------------------
def _call_head(x, w_p, b_p, num_classes, write_logits, write_probs, out_dtype, tile_b):
    B, D = x.shape
    Dp, Cp = w_p.shape
    tile_b = _round_up(int(tile_b), _SUBLANE_BF16)

    Bp = _round_up(B, _SUBLANE_BF16)
    if Bp > tile_b:
        Bp = _round_up(Bp, tile_b)
    # Only the activations get padded per call; W/b were prepared once at init.
    x_p = jnp.pad(x, ((0, Bp - B), (0, Dp - D)))

    n_out = int(write_logits) + int(write_probs)
    out_shape = tuple(jax.ShapeDtypeStruct((Bp, Cp), out_dtype) for _ in range(n_out))
    kernel = functools.partial(_head_kernel, num_classes, w_p.dtype,
                               write_logits, write_probs)

    if Bp <= tile_b:
        # Single tile: skip the grid/pipeline machinery entirely.
        outs = pl.pallas_call(
            kernel,
            out_shape=out_shape,
            in_specs=[_VMEM_FULL, _VMEM_FULL, _VMEM_FULL],
            out_specs=tuple(_VMEM_FULL for _ in range(n_out)),
        )(x_p, w_p, b_p)
    else:
        # Batch grid, "parallel" so v7x's 2 TensorCores split it (neutral on
        # v5e/v6e).  Weight/bias index_maps are constant -> VMEM-resident.
        grid = (Bp // tile_b,)
        outs = pl.pallas_call(
            kernel,
            out_shape=out_shape,
            grid_spec=pltpu.PrefetchScalarGridSpec(
                num_scalar_prefetch=0,
                grid=grid,
                in_specs=[
                    pl.BlockSpec((tile_b, Dp), lambda i: (i, 0)),
                    pl.BlockSpec((Dp, Cp), lambda i: (0, 0)),
                    pl.BlockSpec((1, Cp), lambda i: (0, 0)),
                ],
                out_specs=tuple(
                    pl.BlockSpec((tile_b, Cp), lambda i: (i, 0)) for _ in range(n_out)
                ),
            ),
            compiler_params=pltpu.CompilerParams(
                dimension_semantics=("parallel",)),
        )(x_p, w_p, b_p)
    return outs, B


# ----------------------------------------------------------------------------
# Jitted entry points
# ----------------------------------------------------------------------------
@functools.partial(jax.jit, static_argnames=("num_classes", "out_dtype", "tile_b"))
def text_classifier_decode(encoded, w_p, b_p, *, num_classes,
                           out_dtype=jnp.float32, tile_b=_TILE_B):
    """decode(): logits[B, C] = encoded[B, D] @ W[D, C] + b."""
    outs, B = _call_head(encoded, w_p, b_p, num_classes, True, False, out_dtype, tile_b)
    return outs[0][:B, :num_classes]


@functools.partial(jax.jit, static_argnames=("num_classes", "out_dtype", "tile_b"))
def text_classifier_predict(encoded, w_p, b_p, *, num_classes,
                            out_dtype=jnp.float32, tile_b=_TILE_B):
    """predict(): softmax probs[B, C] and categorical labels[B] (int32)."""
    outs, B = _call_head(encoded, w_p, b_p, num_classes, False, True, out_dtype, tile_b)
    probs = outs[0][:B, :num_classes]
    preds = jnp.argmax(probs, axis=1).astype(jnp.int32)   # matches torch.argmax(softmax, 1)
    return probs, preds


@functools.partial(jax.jit, static_argnames=("num_classes", "out_dtype", "tile_b"))
def text_classifier_decode_and_predict(encoded, w_p, b_p, *, num_classes,
                                       out_dtype=jnp.float32, tile_b=_TILE_B):
    """Fused decode+predict: one weight DMA, one matmul, two outputs."""
    outs, B = _call_head(encoded, w_p, b_p, num_classes, True, True, out_dtype, tile_b)
    logits = outs[0][:B, :num_classes]
    probs = outs[1][:B, :num_classes]
    preds = jnp.argmax(probs, axis=1).astype(jnp.int32)
    return logits, probs, preds


# ----------------------------------------------------------------------------
# Parameter preparation (ONCE, outside the per-call hot path) + head wrapper
# ----------------------------------------------------------------------------
def prepare_text_classifier_params(weight_cd, bias_c, *, param_dtype=jnp.bfloat16):
    """Transpose, cast and pad the Linear params once at construction.

    weight_cd: [C, D] (torch Linear layout), bias_c: [C].
    Returns (w_p[Dp, Cp] in param_dtype, b_p[1, Cp] in f32).
    """
    C, D = weight_cd.shape
    Dp, Cp = _round_up(D, _LANE), _round_up(C, _LANE)
    w_dc = jnp.transpose(weight_cd).astype(param_dtype)                 # [D, C]
    w_p = jnp.pad(w_dc, ((0, Dp - D), (0, Cp - C)))
    b_p = jnp.pad(jnp.reshape(bias_c, (1, C)).astype(jnp.float32),
                  ((0, 0), (0, Cp - C)))
    return w_p, b_p


class TextClassifierHead:
    """Pallas TPU equivalent of TextClassifier's decoder + softmax head.

    # TODO(synk): the upstream LanguageModel/MultiEncoder encoder (and the
    # DME-attention / CrossEntropyLoss / metric paths) are arbitrary
    # transformers and training utilities — not re-implemented here.  This
    # head consumes the encoder's pooled output [B, D] directly, matching
    # TextClassifier.decode() / predict().
    """

    def __init__(self, weight_cd, bias_c, *, param_dtype=jnp.bfloat16,
                 out_dtype=jnp.float32):
        self.num_classes = int(weight_cd.shape[0])
        self.out_dtype = out_dtype
        self.w_p, self.b_p = prepare_text_classifier_params(
            weight_cd, bias_c, param_dtype=param_dtype)

    def decode(self, encoded):
        return text_classifier_decode(encoded, self.w_p, self.b_p,
                                      num_classes=self.num_classes,
                                      out_dtype=self.out_dtype)

    def predict(self, encoded):
        return text_classifier_predict(encoded, self.w_p, self.b_p,
                                       num_classes=self.num_classes,
                                       out_dtype=self.out_dtype)

    def decode_and_predict(self, encoded):
        return text_classifier_decode_and_predict(encoded, self.w_p, self.b_p,
                                                  num_classes=self.num_classes,
                                                  out_dtype=self.out_dtype)


def xavier_uniform(key, out_features, in_features, dtype=jnp.float32):
    # torch.nn.init.xavier_uniform_ for a [out, in] Linear weight
    limit = (6.0 / (in_features + out_features)) ** 0.5
    return jax.random.uniform(key, (out_features, in_features), dtype=dtype,
                              minval=-limit, maxval=limit)


if __name__ == "__main__":
    batch = 2
    embedding_length = 32    # encoder.embedding_length
    num_classes = 8

    key = jax.random.PRNGKey(0)
    k_x, k_x2, k_w, k_b = jax.random.split(key, 4)

    encoded = jax.random.normal(k_x, (batch, embedding_length), dtype=jnp.float32)

    # decoder = nn.Linear(embedding_length, num_classes), xavier_uniform_ weight
    w_cd = xavier_uniform(k_w, num_classes, embedding_length)           # [C, D]
    bound = 1.0 / (embedding_length ** 0.5)
    bias = jax.random.uniform(k_b, (num_classes,), dtype=jnp.float32,
                              minval=-bound, maxval=bound)              # [C]

    head = TextClassifierHead(w_cd, bias, param_dtype=jnp.bfloat16,
                              out_dtype=jnp.float32)

    logits = head.decode(encoded)
    probs, preds = head.predict(encoded)
    f_logits, f_probs, f_preds = head.decode_and_predict(encoded)

    # Also exercise the batch-gridded ("parallel") path with a small tile.
    encoded_big = jax.random.normal(k_x2, (40, embedding_length), dtype=jnp.float32)
    logits_g = text_classifier_decode(encoded_big, head.w_p, head.b_p,
                                      num_classes=num_classes, tile_b=16)
    probs_g, preds_g = text_classifier_predict(encoded_big, head.w_p, head.b_p,
                                               num_classes=num_classes, tile_b=16)

    jax.block_until_ready((logits, probs, preds, f_logits, f_probs, f_preds,
                           logits_g, probs_g, preds_g))

    # Pure-JAX reference with the SAME dtype policy (bf16 params/activations,
    # f32 accumulate) — the explicit dtype contract of this head.
    def ref_head(x):
        xb = x.astype(jnp.bfloat16).astype(jnp.float32)
        wb = jnp.transpose(w_cd).astype(jnp.bfloat16).astype(jnp.float32)
        lg = xb @ wb + bias[None, :]
        pr = jax.nn.softmax(lg, axis=1)
        return lg, pr, jnp.argmax(pr, axis=1).astype(jnp.int32)

    rl, rp, rpred = ref_head(encoded)
    assert logits.shape == (batch, num_classes)
    assert probs.shape == (batch, num_classes)
    assert preds.shape == (batch,)
    assert jnp.allclose(logits, rl, atol=1e-3, rtol=1e-3)
    assert jnp.allclose(probs, rp, atol=2e-3, rtol=2e-3)     # approx reciprocal
    assert jnp.array_equal(preds, rpred)
    assert jnp.allclose(f_logits, rl, atol=1e-3, rtol=1e-3)
    assert jnp.allclose(f_probs, rp, atol=2e-3, rtol=2e-3)
    assert jnp.array_equal(f_preds, rpred)

    rlg, rpg, rpredg = ref_head(encoded_big)
    assert jnp.allclose(logits_g, rlg, atol=1e-3, rtol=1e-3)
    assert jnp.allclose(probs_g, rpg, atol=2e-3, rtol=2e-3)
    assert jnp.array_equal(preds_g, rpredg)

    print("KERNEL_OK")
</pallas_src>

<mosaic_0001>
module attributes {stable_mosaic.version = 11 : i64} {
  func.func @_head_kernel(%arg0: memref<16x128xf32, #tpu.memory_space<vmem>>, %arg1: memref<128x128xbf16, #tpu.memory_space<vmem>>, %arg2: memref<1x128xf32, #tpu.memory_space<vmem>>, %arg3: memref<16x128xf32, #tpu.memory_space<vmem>>) attributes {dimension_semantics = [], scalar_prefetch = 0 : i64, scratch_operands = 0 : i64, tpu.core_type = #tpu.core_type<tc>} {
    %c0 = arith.constant 0 : index
    %c0_0 = arith.constant 0 : index
    %0 = vector.load %arg0[%c0, %c0_0] : memref<16x128xf32, #tpu.memory_space<vmem>>, vector<16x128xf32>
    %1 = arith.truncf %0 : vector<16x128xf32> to vector<16x128xbf16>
    %c0_1 = arith.constant 0 : index
    %c0_2 = arith.constant 0 : index
    %2 = vector.load %arg1[%c0_1, %c0_2] : memref<128x128xbf16, #tpu.memory_space<vmem>>, vector<128x128xbf16>
    %cst = arith.constant dense<0.000000e+00> : vector<16x128xf32>
    %3 = tpu.matmul %1, %2, %cst {dimension_numbers = #tpu.dot_dimension_numbers<[1], [0], [0], [1], [0, 0, 1, 1], [], []>} : vector<16x128xbf16>, vector<128x128xbf16>, vector<16x128xf32> -> vector<16x128xf32>
    %c0_3 = arith.constant 0 : index
    %c0_4 = arith.constant 0 : index
    %4 = vector.load %arg2[%c0_3, %c0_4] : memref<1x128xf32, #tpu.memory_space<vmem>>, vector<1x128xf32>
    %5 = vector.broadcast %4 : vector<1x128xf32> to vector<16x128xf32>
    %6 = arith.addf %3, %5 : vector<16x128xf32>
    %c0_5 = arith.constant 0 : index
    %c0_6 = arith.constant 0 : index
    %7 = vector.load %arg3[%c0_5, %c0_6] : memref<16x128xf32, #tpu.memory_space<vmem>>, vector<16x128xf32>
    tpu.vector_store %arg3[%c0_5, %c0_6], %6 {strides = array<i32>} : memref<16x128xf32, #tpu.memory_space<vmem>>, vector<16x128xf32>,
    return
  }
}

</mosaic_0001>

<bundles_post_ra>
// kernel: text_classifier_decode.1
= control target key start
LH: loop header
LB: loop body
LE: loop exit
PB: predicated region body
PF: predicated region fallthrough
CT: control target
= control target key end

     0   :  { %8 = vsyncpa [#allocation3], 0  ;;  %s224_s12 = smov [#allocation2]   ;;  %s267_s0 = inlined_call_operand.vmem [shape: f32[16,128], index: 0, kind: input, shape index: {}]   ;;  %s268_s1 = inlined_call_operand.hbm [shape: bf16[128,128], index: 1, kind: input, shape index: {}]   ;;  %s269_s2 = inlined_call_operand.vmem [shape: f32[1,128], index: 2, kind: input, shape index: {}]   ;;  %s270_s3 = inlined_call_operand.vmem [shape: f32[16,128], index: 3, kind: output, shape index: {}]  }
   0x1   :  { %s16_s13 = sshll.u32 %s224_s12, 4  ;;  %s17_s13 = int_to_ptr.vmem [resolvable:$true] %s16_s13 }
   0x2   :  { %s210_s14 = scalar_lea.vmem %s17_s13, 1024  ;;  %p215_p1 = scmp.lt.s32.totalorder %s17_s13, %s17_s13 }
   0x3   :  { %p211_p0 = scmp.ne.s32.totalorder %s17_s13, %s210_s14  ;;  %p216_p2 = scmp.lt.s32.totalorder %s210_s14, %s210_s14 }
   0x5   :  { %p217_p3 = por %p216_p2, %p215_p1 }
   0x7   :  { %p218_p4 = pnand %p217_p3, %p211_p0 }
   0x9   :  { %221 = shalt.err (!%p218_p4)
}
   0xa   :  { %s225_s15 = smov 64   ;;  %s226_s16 = smov 4  }
   0xb   :  { %22 = dma.hbm_to_vmem [thread:$0]  %s268_s1, 1024, %s17_s13, [#allocation3], %s225_s15, %s225_s15, %s226_s16  }
   0xc   :  { %222 = dma.done.wait [#allocation3], 1024  }
   0xd   :  { %223 = vsyncadd [#allocation3], 4294966272  ;;  %v227_v0 = vmov 0.0   ;;  %vm228_vm0 = vmmov 0   ;;  %v194_v1 = vld [vmem:[#allocation2 + $0x38] sm:$0xff]   ;;  %v195_v2 = vld [vmem:[#allocation2 + $0x30] sm:$0xff]  }
   0xe   :  { %169 = vmatprep.subr.bf16.mxu0 %v227_v0  ;;  %185 = vmatprep.mubr.msk.bf16.mxu0 %vm228_vm0, %v227_v0  ;;  %v196_v3 = vld [vmem:[#allocation2 + $0x28] sm:$0xff]   ;;  %v197_v4 = vld [vmem:[#allocation2 + $0x20] sm:$0xff]   ;;  %v198_v5 = vld [vmem:[#allocation2 + $0x18] sm:$0xff]  }
   0xf   :  { %170 = vmatpush3.bf16.msra.mxu0 %v194_v1  ;;  %v199_v6 = vld [vmem:[#allocation2 + $0x10] sm:$0xff]   ;;  %v200_v7 = vld [vmem:[#allocation2 + $0x8] sm:$0xff]   ;;  %v201_v8 = vld [vmem:[#allocation2] sm:$0xff]  }
  0x10   :  { %171 = vmatprep.subr.bf16.mxu0 %v227_v0  ;;  %v29_v9 = vld [vmem:[%s267_s0] sm:$0xff]  ;;  %v30_v10 = vld [vmem:[%s267_s0 + $0x8] sm:$0xff] }
  0x11   :  { %v31_v11 = vpack.c.bf16 %v30_v10, %v29_v9  ;;  %v151_v12 = vld [vmem:[%s269_s2] ss:$0 sm:$0xff] }
  0x13   :  { %172 = vmatpush3.bf16.msra.mxu0 %v195_v2 }
  0x14   :  { %173 = vmatprep.subr.bf16.mxu0 %v227_v0 }
  0x17   :  { %174 = vmatpush3.bf16.msra.mxu0 %v196_v3 }
  0x18   :  { %175 = vmatprep.subr.bf16.mxu0 %v227_v0 }
  0x1b   :  { %176 = vmatpush3.bf16.msra.mxu0 %v197_v4 }
  0x1c   :  { %177 = vmatprep.subr.bf16.mxu0 %v227_v0 }
  0x1f   :  { %178 = vmatpush3.bf16.msra.mxu0 %v198_v5 }
  0x20   :  { %179 = vmatprep.subr.bf16.mxu0 %v227_v0 }
  0x23   :  { %180 = vmatpush3.bf16.msra.mxu0 %v199_v6 }
  0x24   :  { %181 = vmatprep.subr.bf16.mxu0 %v227_v0 }
  0x27   :  { %182 = vmatpush3.bf16.msra.mxu0 %v200_v7 }
  0x28   :  { %183 = vmatprep.subr.bf16.mxu0 %v227_v0 }
  0x2b   :  { %184 = vmatpush3.bf16.msra.mxu0 %v201_v8 }
  0x2e   :  { %186 = vmatmul.mubr.bf16.vlgmr.msra.gmra.mxu0 %v31_v11 }
  0xee   :  { %v137_v13 = vpop.f32.mrf.mxu0 }
  0xef   :  { %v138_v14 = vadd.f32 %v151_v12, %v137_v13 }
  0xf0   :  { %v187_v15 = vpop.f32.mrf.mxu0 }
  0xf1   :  { %144 = vst [vmem:[%s270_s3] sm:$0xff] %v138_v14 }
  0xf2   :  { %v140_v16 = vpop.f32.mrf.mxu0 }
  0xf3   :  { %v141_v17 = vadd.f32 %v151_v12, %v140_v16 }
  0xf4   :  { %v188_v18 = vpop.f32.mrf.mxu0 }
  0xf5   :  { %145 = vst [vmem:[%s270_s3 + $0x8] sm:$0xff] %v141_v17 }
  0xf6   :  { %150 = vsyncpa [#allocation3], 1 }

</bundles_post_ra>
